<compile_context>
chip_gen: v5e
topology: v5e:2x2
jax: 0.10.0
libtpu: 0.0.40
codegen_flags: <defaults>
</compile_context>

<pallas_src>
import jax
import jax.numpy as jnp
from jax.experimental import pallas as pl
from jax.experimental.pallas import tpu as pltpu


def _round_up(x, m):
    return (x + m - 1) // m * m


# ----------------------------------------------------------------------------
# Kernel bodies (one batch tile, both critics fused).
# ----------------------------------------------------------------------------
def _q_pair(state_ref, action_ref, w1s_ref, w1a_ref, b1_ref,
            w2_ref, b2_ref, w3_ref, b3_ref):
    """Shared compute: returns the packed (tb, 2) f32 [q1, q2] tile."""
    cd = w1s_ref.dtype  # MXU compute dtype (bf16 on v6e/v7x; f32 for checking)

    # NOTE(precision): inputs are cast to the compute dtype before the layer-1
    # dot. Large-magnitude observations lose mantissa in bf16; if the critic is
    # precision sensitive, pack with compute_dtype=jnp.float32 (K<=in_dim is
    # tiny, the MXU cost difference is negligible).
    s = state_ref[...].astype(cd)
    a = action_ref[...].astype(cd)

    # Layer 1: torch.cat([state, action]) is replaced by two dots accumulating
    # into the same (tb, hp) tile; hp packs both critics' hidden units
    # side-by-side, lane-dense (padded to a multiple of 128).
    h = (jnp.dot(s, w1s_ref[...], preferred_element_type=jnp.float32)
         + jnp.dot(a, w1a_ref[...], preferred_element_type=jnp.float32)
         + b1_ref[...])
    h = jnp.maximum(h, 0.0)

    # Layer 2: block-diagonal fused weight -> one MXU push for both critics.
    h = jnp.dot(h.astype(cd), w2_ref[...],
                preferred_element_type=jnp.float32) + b2_ref[...]
    h = jnp.maximum(h, 0.0)

    # Layer 3: (hp, 2); column 0 = q1, column 1 = q2.
    return jnp.dot(h.astype(cd), w3_ref[...],
                   preferred_element_type=jnp.float32) + b3_ref[...]


def _kernel_q12(state_ref, action_ref, w1s_ref, w1a_ref, b1_ref,
                w2_ref, b2_ref, w3_ref, b3_ref, q12_ref):
    q12_ref[...] = _q_pair(state_ref, action_ref, w1s_ref, w1a_ref, b1_ref,
                           w2_ref, b2_ref, w3_ref, b3_ref)


def _kernel_qmin(state_ref, action_ref, w1s_ref, w1a_ref, b1_ref,
                 w2_ref, b2_ref, w3_ref, b3_ref, qmin_ref):
    q = _q_pair(state_ref, action_ref, w1s_ref, w1a_ref, b1_ref,
                w2_ref, b2_ref, w3_ref, b3_ref)
    # Fused epilogue: min(q1, q2) while the data is still in vregs.
    qmin_ref[...] = jnp.min(q, axis=-1, keepdims=True)


# ----------------------------------------------------------------------------
# Parameter packing (call once, reuse across steps).
# ----------------------------------------------------------------------------
def pack_double_critic_params(params, state_dim, compute_dtype=jnp.bfloat16):
    """Fuse q1/q2 weights into wide / block-diagonal arrays, pad lanes to 128.

    params: {"q1": (w1, b1, w2, b2, w3, b3), "q2": (...)} with weights stored
    as (in_features, out_features) and biases as (1, out_features).
    """
    w1_1, b1_1, w2_1, b2_1, w3_1, b3_1 = params["q1"]
    w1_2, b1_2, w2_2, b2_2, w3_2, b3_2 = params["q2"]
    in_dim, hidden = w1_1.shape
    fused = 2 * hidden
    hp = _round_up(max(fused, 128), 128)  # lane-dense fused hidden width

    f32 = jnp.float32
    # Layer 1: (in_dim, 2H), zero-padded to hp lanes.
    w1 = (jnp.zeros((in_dim, hp), f32)
          .at[:, :hidden].set(w1_1.astype(f32))
          .at[:, hidden:fused].set(w1_2.astype(f32)))
    b1 = (jnp.zeros((1, hp), f32)
          .at[:, :hidden].set(b1_1.astype(f32))
          .at[:, hidden:fused].set(b1_2.astype(f32)))
    # Layer 2: block-diagonal (hp, hp) — pad rows/cols stay zero (ReLU(0)=0).
    w2 = (jnp.zeros((hp, hp), f32)
          .at[:hidden, :hidden].set(w2_1.astype(f32))
          .at[hidden:fused, hidden:fused].set(w2_2.astype(f32)))
    b2 = (jnp.zeros((1, hp), f32)
          .at[:, :hidden].set(b2_1.astype(f32))
          .at[:, hidden:fused].set(b2_2.astype(f32)))
    # Layer 3: (hp, 2); critic 1 feeds column 0, critic 2 column 1.
    w3 = (jnp.zeros((hp, 2), f32)
          .at[:hidden, 0:1].set(w3_1.astype(f32))
          .at[hidden:fused, 1:2].set(w3_2.astype(f32)))
    b3 = jnp.concatenate([b3_1.astype(f32), b3_2.astype(f32)], axis=1)  # (1, 2)

    cd = compute_dtype
    return {
        "w1s": w1[:state_dim].astype(cd),   # (state_dim, hp)
        "w1a": w1[state_dim:].astype(cd),   # (action_dim, hp)
        "b1": b1,                           # (1, hp) f32
        "w2": w2.astype(cd),                # (hp, hp)
        "b2": b2,                           # (1, hp) f32
        "w3": w3.astype(cd),                # (hp, 2)
        "b3": b3,                           # (1, 2) f32
        "state_dim": int(state_dim),
    }


# ----------------------------------------------------------------------------
# pallas_call wrapper.
# ----------------------------------------------------------------------------
def _const_spec(shape):
    """Resident weight/bias spec: constant index_map, single-buffered.

    Constant index_maps mean these tiles are DMA'd once; Buffered(1) stops the
    pipeline from allocating a useless second buffer (w2 alone is hp^2 bytes).
    """
    try:
        return pl.BlockSpec(shape, lambda i: (0, 0), pipeline_mode=pl.Buffered(1))
    except TypeError:  # older jax without pipeline_mode: fall back to default.
        return pl.BlockSpec(shape, lambda i: (0, 0))


def _pick_batch_tile(B, batch_tile):
    # Per-grid-step overhead (~0.35 us) dominates at realistic critic sizes, so
    # use the largest tile that keeps the footprint sane. For mid-sized batches
    # split into >= 2 programs so v7x's two TensorCores both get work (no
    # effect on single-TC v5e/v6e). Full block for tiny batches (block_shape ==
    # full dim satisfies the (8,128) rule).
    if B > batch_tile:
        return batch_tile
    if B > 16:
        half = _round_up(-(-B // 2), 8)  # sublane-aligned ceil(B/2)
        if half < B:
            return half
    return B


def _double_critic_pallas(state, action, packed, *, mode, batch_tile=1024):
    B, sd = state.shape
    Ba, ad = action.shape
    assert B == Ba
    assert sd == packed["state_dim"], "state_dim mismatch with packed params"
    hp = packed["w2"].shape[0]

    tb = _pick_batch_tile(B, batch_tile)
    grid = (pl.cdiv(B, tb),)
    # Ragged final tile (B % tb != 0): padded rows feed garbage through the
    # matmuls, but rows are independent and out-of-bounds writes are masked,
    # so valid outputs are unaffected. Do NOT "fix" by asserting divisibility.

    if mode == "q12":
        kernel = _kernel_q12
        out_shape = jax.ShapeDtypeStruct((B, 2), jnp.float32)
        out_specs = pl.BlockSpec((tb, 2), lambda i: (i, 0))
        n_out = 2
    elif mode == "qmin":
        kernel = _kernel_qmin
        out_shape = jax.ShapeDtypeStruct((B, 1), jnp.float32)
        out_specs = pl.BlockSpec((tb, 1), lambda i: (i, 0))
        n_out = 1
    else:
        raise ValueError(mode)

    # VMEM budget derived from the real footprint so bigger tiles / wider
    # hidden compile cleanly on v7x (64 MiB physical, 32 MiB scoped default).
    cd_bytes = jnp.dtype(packed["w2"].dtype).itemsize
    in_bytes = max(jnp.dtype(state.dtype).itemsize, jnp.dtype(action.dtype).itemsize)
    weight_bytes = (sd * hp + ad * hp + hp * hp + 2 * hp) * cd_bytes + (hp + 2) * 4
    io_bytes = tb * (sd + ad) * in_bytes + tb * n_out * 4
    work_bytes = 4 * tb * hp * 4            # in-kernel f32 activations / temps
    footprint = 2 * weight_bytes + 2 * io_bytes + work_bytes
    vmem_limit = int(min(64 << 20, max(2 * footprint, 16 << 20)))

    return pl.pallas_call(
        kernel,
        out_shape=out_shape,
        grid=grid,
        in_specs=[
            pl.BlockSpec((tb, sd), lambda i: (i, 0)),   # state (native dtype)
            pl.BlockSpec((tb, ad), lambda i: (i, 0)),   # action (native dtype)
            _const_spec(packed["w1s"].shape),
            _const_spec(packed["w1a"].shape),
            _const_spec(packed["b1"].shape),
            _const_spec(packed["w2"].shape),
            _const_spec(packed["b2"].shape),
            _const_spec(packed["w3"].shape),
            _const_spec(packed["b3"].shape),
        ],
        out_specs=out_specs,
        compiler_params=pltpu.CompilerParams(
            dimension_semantics=("parallel",),   # megacore batch sharding (v7x)
            vmem_limit_bytes=vmem_limit),
    )(state, action,
      packed["w1s"], packed["w1a"], packed["b1"],
      packed["w2"], packed["b2"],
      packed["w3"], packed["b3"])


def double_critic_forward_packed(state, action, packed, *, batch_tile=1024):
    """Returns the packed (B, 2) array with q1 in column 0 and q2 in column 1.

    Preferred in tight RL loops: avoids two lane-misaligned slice ops per call.
    """
    return _double_critic_pallas(state, action, packed, mode="q12",
                                 batch_tile=batch_tile)


def double_critic_forward(state, action, packed, *, batch_tile=1024):
    """Returns (q1, q2), matching DoubleCritic.forward."""
    q12 = double_critic_forward_packed(state, action, packed, batch_tile=batch_tile)
    return q12[:, 0:1], q12[:, 1:2]


def double_critic_q(state, action, packed, *, batch_tile=1024):
    """Returns min(q1, q2), matching DoubleCritic.q (min fused in-kernel)."""
    return _double_critic_pallas(state, action, packed, mode="qmin",
                                 batch_tile=batch_tile)


# ----------------------------------------------------------------------------
# Test harness: PyTorch-style init + pure-JAX reference.
# ----------------------------------------------------------------------------
def init_mlp_params(key, in_dim, hidden_dim, out_dim):
    ks = jax.random.split(key, 6)

    def lin(kw, kb, fan_in, fan_out):
        bound = 1.0 / jnp.sqrt(jnp.float32(fan_in))
        w = jax.random.uniform(kw, (fan_in, fan_out), jnp.float32, -bound, bound)
        b = jax.random.uniform(kb, (1, fan_out), jnp.float32, -bound, bound)
        return w, b

    w1, b1 = lin(ks[0], ks[1], in_dim, hidden_dim)
    w2, b2 = lin(ks[2], ks[3], hidden_dim, hidden_dim)
    w3, b3 = lin(ks[4], ks[5], hidden_dim, out_dim)
    return (w1, b1, w2, b2, w3, b3)


def reference_forward(state, action, params):
    sa = jnp.concatenate([state, action], axis=-1).astype(jnp.float32)

    def mlp(p):
        w1, b1, w2, b2, w3, b3 = p
        h = jnp.maximum(sa @ w1 + b1, 0.0)
        h = jnp.maximum(h @ w2 + b2, 0.0)
        return h @ w3 + b3

    return mlp(params["q1"]), mlp(params["q2"])


if __name__ == "__main__":
    key = jax.random.PRNGKey(0)
    k_state, k_action, k_q1, k_q2, k_big = jax.random.split(key, 5)

    batch, state_dim, action_dim, hidden_dim = 2, 8, 4, 32
    in_dim = state_dim + action_dim

    state = jax.random.normal(k_state, (batch, state_dim), jnp.float32)
    action = jax.random.normal(k_action, (batch, action_dim), jnp.float32)
    params = {
        "q1": init_mlp_params(k_q1, in_dim, hidden_dim, 1),
        "q2": init_mlp_params(k_q2, in_dim, hidden_dim, 1),
    }

    r1, r2 = reference_forward(state, action, params)
    rmin = jnp.minimum(r1, r2)

    # f32 path: verifies the critic-fusion / block-diag / padding math exactly.
    packed_f32 = pack_double_critic_params(params, state_dim,
                                           compute_dtype=jnp.float32)
    q1, q2 = double_critic_forward(state, action, packed_f32)
    qmin = double_critic_q(state, action, packed_f32)
    jax.block_until_ready((q1, q2, qmin))
    assert q1.shape == (batch, 1) and q2.shape == (batch, 1) and qmin.shape == (batch, 1)
    assert jnp.allclose(q1, r1, atol=1e-4, rtol=1e-4)
    assert jnp.allclose(q2, r2, atol=1e-4, rtol=1e-4)
    assert jnp.allclose(qmin, rmin, atol=1e-4, rtol=1e-4)

    # bf16 MXU path (default; 2x MXU rate + half weight bytes on v6e/v7x).
    packed_bf16 = pack_double_critic_params(params, state_dim)
    q1b, q2b = double_critic_forward(state, action, packed_bf16)
    qminb = double_critic_q(state, action, packed_bf16)
    jax.block_until_ready((q1b, q2b, qminb))
    assert jnp.allclose(q1b, r1, atol=5e-2, rtol=5e-2)
    assert jnp.allclose(q2b, r2, atol=5e-2, rtol=5e-2)
    assert jnp.allclose(qminb, rmin, atol=5e-2, rtol=5e-2)

    # Multi-program-grid path (exercises tile split + ragged last tile).
    Bb = 48
    kbs, kba = jax.random.split(k_big)
    state_b = jax.random.normal(kbs, (Bb, state_dim), jnp.float32)
    action_b = jax.random.normal(kba, (Bb, action_dim), jnp.float32)
    rb1, rb2 = reference_forward(state_b, action_b, params)
    qb12 = double_critic_forward_packed(state_b, action_b, packed_f32)
    qbmin = double_critic_q(state_b, action_b, packed_f32)
    jax.block_until_ready((qb12, qbmin))
    assert qb12.shape == (Bb, 2) and qbmin.shape == (Bb, 1)
    assert jnp.allclose(qb12[:, 0:1], rb1, atol=1e-4, rtol=1e-4)
    assert jnp.allclose(qb12[:, 1:2], rb2, atol=1e-4, rtol=1e-4)
    assert jnp.allclose(qbmin, jnp.minimum(rb1, rb2), atol=1e-4, rtol=1e-4)

    print("KERNEL_OK")
</pallas_src>

<mosaic_0001>
module attributes {stable_mosaic.version = 11 : i64} {
  func.func @_kernel_q12(%arg0: i32, %arg1: memref<2x8xf32, #tpu.memory_space<vmem>>, %arg2: memref<2x4xf32, #tpu.memory_space<vmem>>, %arg3: memref<8x128xf32, #tpu.memory_space<vmem>>, %arg4: memref<4x128xf32, #tpu.memory_space<vmem>>, %arg5: memref<1x128xf32, #tpu.memory_space<vmem>>, %arg6: memref<128x128xf32, #tpu.memory_space<vmem>>, %arg7: memref<1x128xf32, #tpu.memory_space<vmem>>, %arg8: memref<128x2xf32, #tpu.memory_space<vmem>>, %arg9: memref<1x2xf32, #tpu.memory_space<vmem>>, %arg10: memref<2x2xf32, #tpu.memory_space<vmem>>) attributes {dimension_semantics = [#tpu.dimension_semantics<parallel>], iteration_bounds = array<i64: 1>, scalar_prefetch = 0 : i64, scratch_operands = 0 : i64, tpu.core_type = #tpu.core_type<tc>, window_params = [{transform_indices = @transform_0, window_bounds = array<i64: 2, 8>}, {transform_indices = @transform_1, window_bounds = array<i64: 2, 4>}, {pipeline_mode = #tpu.pipeline_mode<synchronous>, transform_indices = @transform_2, window_bounds = array<i64: 8, 128>}, {pipeline_mode = #tpu.pipeline_mode<synchronous>, transform_indices = @transform_3, window_bounds = array<i64: 4, 128>}, {pipeline_mode = #tpu.pipeline_mode<synchronous>, transform_indices = @transform_4, window_bounds = array<i64: 1, 128>}, {pipeline_mode = #tpu.pipeline_mode<synchronous>, transform_indices = @transform_5, window_bounds = array<i64: 128, 128>}, {pipeline_mode = #tpu.pipeline_mode<synchronous>, transform_indices = @transform_6, window_bounds = array<i64: 1, 128>}, {pipeline_mode = #tpu.pipeline_mode<synchronous>, transform_indices = @transform_7, window_bounds = array<i64: 128, 2>}, {pipeline_mode = #tpu.pipeline_mode<synchronous>, transform_indices = @transform_8, window_bounds = array<i64: 1, 2>}, {transform_indices = @transform_9, window_bounds = array<i64: 2, 2>}]} {
    %c0 = arith.constant 0 : index
    %c0_0 = arith.constant 0 : index
    %0 = vector.load %arg1[%c0, %c0_0] : memref<2x8xf32, #tpu.memory_space<vmem>>, vector<2x8xf32>
    %c0_1 = arith.constant 0 : index
    %c0_2 = arith.constant 0 : index
    %1 = vector.load %arg2[%c0_1, %c0_2] : memref<2x4xf32, #tpu.memory_space<vmem>>, vector<2x4xf32>
    %c0_3 = arith.constant 0 : index
    %c0_4 = arith.constant 0 : index
    %2 = vector.load %arg3[%c0_3, %c0_4] : memref<8x128xf32, #tpu.memory_space<vmem>>, vector<8x128xf32>
    %cst = arith.constant dense<0.000000e+00> : vector<2x128xf32>
    %3 = tpu.matmul %0, %2, %cst {dimension_numbers = #tpu.dot_dimension_numbers<[1], [0], [0], [1], [0, 0, 1, 1], [], []>} : vector<2x8xf32>, vector<8x128xf32>, vector<2x128xf32> -> vector<2x128xf32>
    %c0_5 = arith.constant 0 : index
    %c0_6 = arith.constant 0 : index
    %4 = vector.load %arg4[%c0_5, %c0_6] : memref<4x128xf32, #tpu.memory_space<vmem>>, vector<4x128xf32>
    %cst_7 = arith.constant dense<0.000000e+00> : vector<2x128xf32>
    %5 = tpu.matmul %1, %4, %cst_7 {dimension_numbers = #tpu.dot_dimension_numbers<[1], [0], [0], [1], [0, 0, 1, 1], [], []>} : vector<2x4xf32>, vector<4x128xf32>, vector<2x128xf32> -> vector<2x128xf32>
    %6 = arith.addf %3, %5 : vector<2x128xf32>
    %c0_8 = arith.constant 0 : index
    %c0_9 = arith.constant 0 : index
    %7 = vector.load %arg5[%c0_8, %c0_9] : memref<1x128xf32, #tpu.memory_space<vmem>>, vector<1x128xf32>
    %8 = vector.broadcast %7 : vector<1x128xf32> to vector<2x128xf32>
    %9 = arith.addf %6, %8 : vector<2x128xf32>
    %cst_10 = arith.constant 0.000000e+00 : f32
    %10 = vector.broadcast %cst_10 : f32 to vector<2x128xf32>
    %11 = arith.maximumf %9, %10 : vector<2x128xf32>
    %c0_11 = arith.constant 0 : index
    %c0_12 = arith.constant 0 : index
    %12 = vector.load %arg6[%c0_11, %c0_12] : memref<128x128xf32, #tpu.memory_space<vmem>>, vector<128x128xf32>
    %cst_13 = arith.constant dense<0.000000e+00> : vector<2x128xf32>
    %13 = tpu.matmul %11, %12, %cst_13 {dimension_numbers = #tpu.dot_dimension_numbers<[1], [0], [0], [1], [0, 0, 1, 1], [], []>} : vector<2x128xf32>, vector<128x128xf32>, vector<2x128xf32> -> vector<2x128xf32>
    %c0_14 = arith.constant 0 : index
    %c0_15 = arith.constant 0 : index
    %14 = vector.load %arg7[%c0_14, %c0_15] : memref<1x128xf32, #tpu.memory_space<vmem>>, vector<1x128xf32>
    %15 = vector.broadcast %14 : vector<1x128xf32> to vector<2x128xf32>
    %16 = arith.addf %13, %15 : vector<2x128xf32>
    %cst_16 = arith.constant 0.000000e+00 : f32
    %17 = vector.broadcast %cst_16 : f32 to vector<2x128xf32>
    %18 = arith.maximumf %16, %17 : vector<2x128xf32>
    %c0_17 = arith.constant 0 : index
    %c0_18 = arith.constant 0 : index
    %19 = vector.load %arg8[%c0_17, %c0_18] : memref<128x2xf32, #tpu.memory_space<vmem>>, vector<128x2xf32>
    %cst_19 = arith.constant dense<0.000000e+00> : vector<2x2xf32>
    %20 = tpu.matmul %18, %19, %cst_19 {dimension_numbers = #tpu.dot_dimension_numbers<[1], [0], [0], [1], [0, 0, 1, 1], [], []>} : vector<2x128xf32>, vector<128x2xf32>, vector<2x2xf32> -> vector<2x2xf32>
    %c0_20 = arith.constant 0 : index
    %c0_21 = arith.constant 0 : index
    %21 = vector.load %arg9[%c0_20, %c0_21] : memref<1x2xf32, #tpu.memory_space<vmem>>, vector<1x2xf32>
    %22 = vector.broadcast %21 : vector<1x2xf32> to vector<2x2xf32>
    %23 = arith.addf %20, %22 : vector<2x2xf32>
    %c0_22 = arith.constant 0 : index
    %c0_23 = arith.constant 0 : index
    %24 = vector.load %arg10[%c0_22, %c0_23] : memref<2x2xf32, #tpu.memory_space<vmem>>, vector<2x2xf32>
    tpu.vector_store %arg10[%c0_22, %c0_23], %23 {strides = array<i32>} : memref<2x2xf32, #tpu.memory_space<vmem>>, vector<2x2xf32>,
    return
  }
  func.func @transform_0(%arg0: i32) -> (i32, i32) {
    %c0_i32 = arith.constant 0 : i32
    %c0_i32_0 = arith.constant 0 : i32
    return %arg0, %c0_i32 : i32, i32
  }
  func.func @transform_1(%arg0: i32) -> (i32, i32) {
    %c0_i32 = arith.constant 0 : i32
    %c0_i32_0 = arith.constant 0 : i32
    return %arg0, %c0_i32 : i32, i32
  }
  func.func @transform_2(%arg0: i32) -> (i32, i32) {
    %c0_i32 = arith.constant 0 : i32
    %c0_i32_0 = arith.constant 0 : i32
    %c0_i32_1 = arith.constant 0 : i32
    return %c0_i32, %c0_i32_0 : i32, i32
  }
  func.func @transform_3(%arg0: i32) -> (i32, i32) {
    %c0_i32 = arith.constant 0 : i32
    %c0_i32_0 = arith.constant 0 : i32
    %c0_i32_1 = arith.constant 0 : i32
    return %c0_i32, %c0_i32_0 : i32, i32
  }
  func.func @transform_4(%arg0: i32) -> (i32, i32) {
    %c0_i32 = arith.constant 0 : i32
    %c0_i32_0 = arith.constant 0 : i32
    %c0_i32_1 = arith.constant 0 : i32
    return %c0_i32, %c0_i32_0 : i32, i32
  }
  func.func @transform_5(%arg0: i32) -> (i32, i32) {
    %c0_i32 = arith.constant 0 : i32
    %c0_i32_0 = arith.constant 0 : i32
    %c0_i32_1 = arith.constant 0 : i32
    return %c0_i32, %c0_i32_0 : i32, i32
  }
  func.func @transform_6(%arg0: i32) -> (i32, i32) {
    %c0_i32 = arith.constant 0 : i32
    %c0_i32_0 = arith.constant 0 : i32
    %c0_i32_1 = arith.constant 0 : i32
    return %c0_i32, %c0_i32_0 : i32, i32
  }
  func.func @transform_7(%arg0: i32) -> (i32, i32) {
    %c0_i32 = arith.constant 0 : i32
    %c0_i32_0 = arith.constant 0 : i32
    %c0_i32_1 = arith.constant 0 : i32
    return %c0_i32, %c0_i32_0 : i32, i32
  }
  func.func @transform_8(%arg0: i32) -> (i32, i32) {
    %c0_i32 = arith.constant 0 : i32
    %c0_i32_0 = arith.constant 0 : i32
    %c0_i32_1 = arith.constant 0 : i32
    return %c0_i32, %c0_i32_0 : i32, i32
  }
  func.func @transform_9(%arg0: i32) -> (i32, i32) {
    %c0_i32 = arith.constant 0 : i32
    %c0_i32_0 = arith.constant 0 : i32
    return %arg0, %c0_i32 : i32, i32
  }
}

</mosaic_0001>

<bundles_post_ra>
// kernel: tpu_custom_call.1
= control target key start
LH: loop header
LB: loop body
LE: loop exit
PB: predicated region body
PF: predicated region fallthrough
CT: control target
= control target key end

     0   :  { %14 = vsyncpa [#allocation3], 0  ;;  %s523_s0 = inlined_call_operand.vmem [shape: f32[2,8], index: 0, kind: input, shape index: {}]   ;;  %s524_s1 = inlined_call_operand.hbm [shape: f32[2,4], index: 1, kind: input, shape index: {}]   ;;  %s525_s2 = inlined_call_operand.hbm [shape: f32[8,128], index: 2, kind: input, shape index: {}]   ;;  %s526_s3 = inlined_call_operand.hbm [shape: f32[4,128], index: 3, kind: input, shape index: {}]   ;;  %s527_s4 = inlined_call_operand.vmem [shape: f32[1,128], index: 4, kind: input, shape index: {}]   ;;  %s528_s5 = inlined_call_operand.vmem [shape: f32[128,128], index: 5, kind: input, shape index: {}]   ;;  %s529_s6 = inlined_call_operand.vmem [shape: f32[1,128], index: 6, kind: input, shape index: {}]   ;;  %s530_s7 = inlined_call_operand.vmem [shape: f32[128,2], index: 7, kind: input, shape index: {}]   ;;  %s531_s8 = inlined_call_operand.vmem [shape: f32[1,2], index: 8, kind: input, shape index: {}]   ;;  %s532_s9 = inlined_call_operand.hbm [shape: f32[2,2], index: 9, kind: output, shape index: {}]  }
   0x1   :  { %15 = vsyncpa [#allocation6], 0  ;;  %s35_s11 = sshll.u32 %s525_s2, 4  ;;  %s36_s11 = int_to_ptr.hbm [resolvable:$true] %s35_s11 }
   0x2   :  { %16 = vsyncpa [#allocation4], 0  ;;  %s349_s12 = smov [#allocation5]   ;;  %s24_s16 = sshll.u32 %s524_s1, 4  ;;  %s25_s16 = int_to_ptr.hbm [resolvable:$true] %s24_s16 }
   0x3   :  { %s37_s13 = sshll.u32 %s349_s12, 4  ;;  %s350_s17 = smov [#allocation2]   ;;  %s38_s13 = int_to_ptr.vmem [resolvable:$true] %s37_s13 }
   0x4   :  { %40 = dma.hbm_to_vmem [thread:$0]  %s36_s11, 128, %s38_s13, [#allocation6]  }
   0x5   :  { %s26_s18 = sshll.u32 %s350_s17, 4  ;;  %s46_s21 = sshll.u32 %s526_s3, 4  ;;  %s27_s18 = int_to_ptr.vmem [resolvable:$true] %s26_s18  ;;  %s47_s21 = int_to_ptr.hbm [resolvable:$true] %s46_s21 }
   0x6   :  { %29 = dma.hbm_to_vmem [thread:$0]  %s25_s16, 32, %s27_s18, [#allocation3]  }
   0x7   :  { %s351_s2 = smov [#allocation7]  }
   0x8   :  { %s48_s22 = sshll.u32 %s351_s2, 4  ;;  %s49_s22 = int_to_ptr.vmem [resolvable:$true] %s48_s22 }
   0x9   :  { %51 = dma.hbm_to_vmem [thread:$0]  %s47_s21, 64, %s49_s22, [#allocation6]  }
   0xa   :  { %343 = dma.done.wait [#allocation3], 32  }
   0xb   :  { %344 = vsyncadd [#allocation3], 4294967264 }
   0xc   :  { %345 = dma.done.wait [#allocation6], 192  }
   0xd   :  { %346 = vsyncadd [#allocation6], 4294967104  ;;  %vm82_vm0 = vcmask 1043456   ;;  %vm78_vm1 = vcmask 31744   ;;  %vm106_vm2 = vcmask 64512   ;;  %v76_v1 = vld [vmem:[#allocation5] sm:$0xff] }
   0xe   :  { %v77_v0 = vld [vmem:[#allocation7] sm:$0xf]  ;;  %v75_v2 = vld [vmem:[#allocation2] sm:$0x3]  ;;  %125 = vmatpush.msra.mxu1 %v76_v1  ;;  %v151_v4 = vld [vmem:[%s528_s5 + $0x78] sm:$0xff]  ;;  %s352_s18 = smov [#allocation8]  }
   0xf   :  { %237 = vmatpush.msk.msra.mxu0 %vm82_vm0, %v77_v0  ;;  %v74_v3 = vld [vmem:[%s523_s0] sm:$0x3]  ;;  %v150_v5 = vld [vmem:[%s528_s5 + $0x70] sm:$0xff]  ;;  %156 = vmatpush.msra.mxu2 %v151_v4  ;;  %v149_v6 = vld [vmem:[%s528_s5 + $0x68] sm:$0xff]  ;;  %s224_s19 = sshll.u32 %s352_s18, 4  ;;  %s226_s2 = sshll.u32 %s532_s9, 4  ;;  %s225_s19 = int_to_ptr.vmem [resolvable:$true] %s224_s19  ;;  %s227_s2 = int_to_ptr.hbm [resolvable:$true] %s226_s2 }
  0x10   :  { %238 = vmatmul.msk.f32.vlgmr.msra.gmra.mxu0 %vm78_vm1, %v75_v2  ;;  %239 = vmatmul.msk.f32.vlgmr.msra.gmra.mxu1 %vm106_vm2, %v74_v3  ;;  %v148_v7 = vld [vmem:[%s528_s5 + $0x60] sm:$0xff]  ;;  %v147_v8 = vld [vmem:[%s528_s5 + $0x58] sm:$0xff]  ;;  %v146_v9 = vld [vmem:[%s528_s5 + $0x50] sm:$0xff]  ;;  %vm217_vm3 = vcmask 9216  }
  0x11   :  { %157 = vmatpush.msra.mxu2 %v150_v5  ;;  %v145_v10 = vld [vmem:[%s528_s5 + $0x48] sm:$0xff]  ;;  %v144_v11 = vld [vmem:[%s528_s5 + $0x40] sm:$0xff]  ;;  %v143_v12 = vld [vmem:[%s528_s5 + $0x38] sm:$0xff] }
  0x12   :  { %v142_v13 = vld [vmem:[%s528_s5 + $0x30] sm:$0xff]  ;;  %v141_v14 = vld [vmem:[%s528_s5 + $0x28] sm:$0xff]  ;;  %v140_v15 = vld [vmem:[%s528_s5 + $0x20] sm:$0xff] }
  0x13   :  { %158 = vmatpush.msra.mxu2 %v149_v6  ;;  %v139_v16 = vld [vmem:[%s528_s5 + $0x18] sm:$0xff]  ;;  %v138_v17 = vld [vmem:[%s528_s5 + $0x10] sm:$0xff]  ;;  %v137_v18 = vld [vmem:[%s528_s5 + $0x8] sm:$0xff] }
  0x14   :  { %v136_v19 = vld [vmem:[%s528_s5] sm:$0xff]  ;;  %v192_v20 = vld [vmem:[%s530_s7 + $0x78] sm:$0xff]  ;;  %v191_v21 = vld [vmem:[%s530_s7 + $0x70] sm:$0xff] }
  0x15   :  { %159 = vmatpush.msra.mxu2 %v148_v7  ;;  %197 = vmatpush.msra.mxu3 %v192_v20  ;;  %v190_v22 = vld [vmem:[%s530_s7 + $0x68] sm:$0xff]  ;;  %v189_v23 = vld [vmem:[%s530_s7 + $0x60] sm:$0xff]  ;;  %v188_v24 = vld [vmem:[%s530_s7 + $0x58] sm:$0xff] }
  0x16   :  { %v187_v25 = vld [vmem:[%s530_s7 + $0x50] sm:$0xff]  ;;  %v186_v26 = vld [vmem:[%s530_s7 + $0x48] sm:$0xff]  ;;  %v185_v27 = vld [vmem:[%s530_s7 + $0x40] sm:$0xff] }
  0x17   :  { %160 = vmatpush.msra.mxu2 %v147_v8  ;;  %198 = vmatpush.msra.mxu3 %v191_v21  ;;  %v184_v28 = vld [vmem:[%s530_s7 + $0x38] sm:$0xff]  ;;  %v183_v29 = vld [vmem:[%s530_s7 + $0x30] sm:$0xff]  ;;  %v182_v30 = vld [vmem:[%s530_s7 + $0x28] sm:$0xff] }
  0x18   :  { %v181_v31 = vld [vmem:[%s530_s7 + $0x20] sm:$0xff]  ;;  %v180_v32 = vld [vmem:[%s530_s7 + $0x18] sm:$0xff]  ;;  %v179_v39 = vld [vmem:[%s530_s7 + $0x10] sm:$0xff] }
  0x19   :  { %161 = vmatpush.msra.mxu2 %v146_v9  ;;  %199 = vmatpush.msra.mxu3 %v190_v22  ;;  %v244_v33 = vld [vmem:[%s527_s4] ss:$0 sm:$0xff]  ;;  %v178_v40 = vld [vmem:[%s530_s7 + $0x8] sm:$0xff] }
  0x1a   :  { %v177_v41 = vld [vmem:[%s530_s7] sm:$0xff] }
  0x1b   :  { %162 = vmatpush.msra.mxu2 %v145_v10  ;;  %200 = vmatpush.msra.mxu3 %v189_v23  ;;  %v245_v42 = vld [vmem:[%s529_s6] ss:$0 sm:$0xff] }
  0x1c   :  { %v246_v46 = vld [vmem:[%s531_s8] ss:$0 sm:$0xff] }
  0x1d   :  { %163 = vmatpush.msra.mxu2 %v144_v11  ;;  %201 = vmatpush.msra.mxu3 %v188_v24 }
  0x1f   :  { %164 = vmatpush.msra.mxu2 %v143_v12  ;;  %202 = vmatpush.msra.mxu3 %v187_v25 }
  0x21   :  { %165 = vmatpush.msra.mxu2 %v142_v13  ;;  %203 = vmatpush.msra.mxu3 %v186_v26 }
  0x23   :  { %166 = vmatpush.msra.mxu2 %v141_v14  ;;  %204 = vmatpush.msra.mxu3 %v185_v27 }
  0x25   :  { %167 = vmatpush.msra.mxu2 %v140_v15  ;;  %205 = vmatpush.msra.mxu3 %v184_v28 }
  0x27   :  { %168 = vmatpush.msra.mxu2 %v139_v16  ;;  %206 = vmatpush.msra.mxu3 %v183_v29 }
  0x29   :  { %169 = vmatpush.msra.mxu2 %v138_v17  ;;  %207 = vmatpush.msra.mxu3 %v182_v30 }
  0x2b   :  { %170 = vmatpush.msra.mxu2 %v137_v18  ;;  %208 = vmatpush.msra.mxu3 %v181_v31 }
  0x2d   :  { %171 = vmatpush.msra.mxu2 %v136_v19  ;;  %209 = vmatpush.msra.mxu3 %v180_v32 }
  0x2f   :  { %210 = vmatpush.msra.mxu3 %v179_v39 }
  0x31   :  { %211 = vmatpush.msra.mxu3 %v178_v40 }
  0x33   :  { %212 = vmatpush.msra.mxu3 %v177_v41 }
  0x8d   :  { %v103_v34 = vpop.f32.mrf.mxu0  ;;  %v127_v35 = vpop.f32.mrf.mxu1 }
  0x8e   :  { %v128_v36 = vadd.f32 %v127_v35, %v103_v34 }
  0x90   :  { %v134_v37 = vadd.f32 %v244_v33, %v128_v36 }
  0x92   :  { %v135_v38 = vmax.f32 %v134_v37, 0.0 }
  0x94   :  { %172 = vmatmul.f32.vlgmr.msra.gmra.mxu2 %v135_v38 }
 0x117   :  { %v173_v43 = vpop.f32.mrf.mxu2 }
 0x118   :  { %v174_v44 = vadd.f32 %v245_v42, %v173_v43 }
 0x11a   :  { %v176_v45 = vmax.f32 %v174_v44, 0.0 }
 0x11c   :  { %213 = vmatmul.f32.vlgmr.msra.gmra.mxu3 %v176_v45 }
 0x19f   :  { %v214_v47 = vpop.f32.mrf.mxu3 }
 0x1a0   :  { %v215_v48 = vadd.f32 %v246_v46, %v214_v47 }
 0x1a2   :  { %218 = vst.msk [vmem:[#allocation8] sm:$0x3] %vm217_vm3, %v215_v48 }
 0x1a3   :  { %229 = dma.vmem_to_hbm [thread:$0]  %s225_s19, 32, %s227_s2, [#allocation4]  }
 0x1a4   :  { %347 = dma.done.wait [#allocation4], 32  }
 0x1a5   :  { %348 = vsyncadd [#allocation4], 4294967264 }
 0x1a6   :  { %234 = vsyncpa [#allocation3], 1 }
 0x1a7   :  { %235 = vsyncpa [#allocation6], 1 }
 0x1a8   :  { %236 = vsyncpa [#allocation4], 1 }

</bundles_post_ra>
